<compile_context>
chip_gen: v7x
topology: tpu7x:2x2x1
jax: 0.10.0
libtpu: 0.0.40
codegen_flags: <defaults>
</compile_context>

<pallas_src>
import functools

import numpy as np
import jax
import jax.numpy as jnp
from jax.experimental import pallas as pl
from jax.experimental.pallas import tpu as pltpu


_SUBLANE = 16                       # row granularity safe for f32 and bf16 tiles
_TARGET_BLOCK_ELEMS = 512 * 512     # ~1 MiB f32 per operand per grid step


def _round_up(a: int, b: int) -> int:
    return (a + b - 1) // b * b


def _choose_slab(total: int):
    """Pick a lane-dense (rows, cols) factorization; avoid padding if possible."""
    for cols in (2048, 1024, 512, 256, 128):
        if total % cols == 0:
            return total // cols, cols, total          # no pad copy needed
    cols = 128
    padded = _round_up(total, cols)                    # rare fallback
    return padded // cols, cols, padded


def _blend_kernel(x_ref, new_ref, o_ref, *, factor: float):
    """out = x + factor * (new_x - x); compute in f32, store in out dtype."""
    xf = x_ref[...].astype(jnp.float32)
    nf = new_ref[...].astype(jnp.float32)
    o_ref[...] = (xf + factor * (nf - xf)).astype(o_ref.dtype)


def drop_path_blend(x, new_x, factor):
    """Pallas TPU kernel for the DropPath residual blend x + factor*(new_x - x)."""
    assert x.shape == new_x.shape, (x.shape, new_x.shape)
    out_dtype = jnp.result_type(x.dtype, new_x.dtype)

    total = int(np.prod(x.shape)) if x.ndim else 1
    rows, cols, padded = _choose_slab(total)

    # Block rows: target ~1 MiB per operand, never (much) more than the slab,
    # multiple of the sublane tile so the block shape satisfies (8,128)/(16,128).
    bb = min(max(1, _TARGET_BLOCK_ELEMS // cols), rows)
    bb = max(_SUBLANE, _round_up(bb, _SUBLANE))
    grid = (pl.cdiv(rows, bb),)

    def _as_slab(a):
        flat = a.reshape(-1)
        if padded != total:
            flat = jnp.pad(flat, (0, padded - total))
        return flat.reshape(rows, cols)

    x2d, n2d = _as_slab(x), _as_slab(new_x)

    out = pl.pallas_call(
        functools.partial(_blend_kernel, factor=float(factor)),
        out_shape=jax.ShapeDtypeStruct((rows, cols), out_dtype),
        grid_spec=pltpu.PrefetchScalarGridSpec(
            num_scalar_prefetch=0,
            grid=grid,
            in_specs=[
                pl.BlockSpec((bb, cols), lambda i: (i, 0)),
                pl.BlockSpec((bb, cols), lambda i: (i, 0)),
            ],
            out_specs=pl.BlockSpec((bb, cols), lambda i: (i, 0)),
        ),
        compiler_params=pltpu.CompilerParams(
            dimension_semantics=("parallel",)),
    )(x2d, n2d)

    if padded == total:
        return out.reshape(x.shape)
    return out.reshape(-1)[:total].reshape(x.shape)


class DropPath:
    """JAX/Pallas equivalent of MSSFNet's DropPath (stochastic-depth wrapper).

    `module` is any callable mapping *feats -> feats-like output (arbitrary JAX
    code; NOT part of the Pallas kernel).  Only the residual blend that
    DropPath itself computes runs as a TPU kernel.
    """

    def __init__(self, drop_rate, module):
        self.drop_rate = float(drop_rate)
        self.module = module
        self.training = True

    def __call__(self, *feats):
        # TODO(synk): the stochastic-depth coin flip is host-side Python RNG
        # (np.random.rand in the reference) — control flow, not a TPU kernel.
        if self.training and np.random.rand() < self.drop_rate:
            return feats
        new_feats = self.module(*feats)
        factor = 1.0 / (1.0 - self.drop_rate) if self.training else 1.0
        if self.training and factor != 1.0:
            new_tuple = (tuple(new_feats) if isinstance(new_feats, (tuple, list))
                         else (new_feats,))
            new_feats = tuple(drop_path_blend(x, nx, factor)
                              for x, nx in zip(feats, new_tuple))
        return new_feats


if __name__ == "__main__":
    key = jax.random.PRNGKey(0)
    k1, k2 = jax.random.split(key)

    # Wrapped sub-module: deterministic JAX callable (stand-in for the nn block
    # that DropPath wraps inside MSSFNet).
    def inner_module(x):
        return (jnp.tanh(x) * 1.5 + 0.25,)

    drop_rate = 0.25
    factor = 1.0 / (1.0 - drop_rate)

    # ---- training, module applied, residual blend (the Pallas path) --------
    x = jax.random.normal(k1, (2, 4, 16, 16), dtype=jnp.float32)
    dp = DropPath(drop_rate, inner_module)
    dp.training = True
    np.random.seed(0)                      # rand() = 0.5488 >= 0.25 -> keep path
    (out,) = dp(x)
    out = jax.block_until_ready(out)
    expected = x + factor * (inner_module(x)[0] - x)
    np.testing.assert_allclose(np.asarray(out), np.asarray(expected),
                               rtol=1e-5, atol=1e-5)

    # ---- training, path dropped: identity on the inputs ---------------------
    dp_drop = DropPath(1.0, inner_module)
    dp_drop.training = True
    (out_drop,) = dp_drop(x)
    np.testing.assert_allclose(np.asarray(out_drop), np.asarray(x))

    # ---- eval: plain module output, factor == 1.0 ---------------------------
    dp.training = False
    (out_eval,) = dp(x)
    np.testing.assert_allclose(np.asarray(jax.block_until_ready(out_eval)),
                               np.asarray(inner_module(x)[0]),
                               rtol=1e-6, atol=1e-6)

    # ---- larger input: multiple lane-dense grid steps, no pad copy ----------
    xb = jax.random.normal(k2, (8, 64, 32, 32), dtype=jnp.float32)
    dp.training = True
    np.random.seed(1)                      # rand() = 0.4170 >= 0.25 -> keep path
    (out_big,) = dp(xb)
    out_big = jax.block_until_ready(out_big)
    expected_big = xb + factor * (inner_module(xb)[0] - xb)
    np.testing.assert_allclose(np.asarray(out_big), np.asarray(expected_big),
                               rtol=1e-5, atol=1e-5)

    # ---- odd size: exercises the pad fallback path ---------------------------
    xo = jax.random.normal(k2, (3, 5, 7), dtype=jnp.float32)
    no = inner_module(xo)[0]
    out_odd = jax.block_until_ready(drop_path_blend(xo, no, factor))
    np.testing.assert_allclose(np.asarray(out_odd),
                               np.asarray(xo + factor * (no - xo)),
                               rtol=1e-5, atol=1e-5)

    # ---- bf16 inputs: native-dtype loads, f32 compute inside the kernel -----
    xh = x.astype(jnp.bfloat16)
    nh = inner_module(xh)[0]
    out_bf16 = jax.block_until_ready(drop_path_blend(xh, nh, factor))
    ref_bf16 = (xh.astype(jnp.float32)
                + factor * (nh.astype(jnp.float32) - xh.astype(jnp.float32)))
    np.testing.assert_allclose(np.asarray(out_bf16.astype(jnp.float32)),
                               np.asarray(ref_bf16), rtol=2e-2, atol=2e-2)

    print("KERNEL_OK")
</pallas_src>

<mosaic_0001>
module attributes {stable_mosaic.version = 11 : i64} {
  func.func @_blend_kernel(%arg0: i32, %arg1: memref<16x2048xf32, #tpu.memory_space<vmem>>, %arg2: memref<16x2048xf32, #tpu.memory_space<vmem>>, %arg3: memref<16x2048xf32, #tpu.memory_space<vmem>>) attributes {dimension_semantics = [#tpu.dimension_semantics<parallel>], iteration_bounds = array<i64: 1>, scalar_prefetch = 0 : i64, scratch_operands = 0 : i64, tpu.core_type = #tpu.core_type<tc>, window_params = [{transform_indices = @transform_0, window_bounds = array<i64: 16, 2048>}, {transform_indices = @transform_1, window_bounds = array<i64: 16, 2048>}, {transform_indices = @transform_2, window_bounds = array<i64: 16, 2048>}]} {
    %c0 = arith.constant 0 : index
    %c0_0 = arith.constant 0 : index
    %0 = vector.load %arg1[%c0, %c0_0] : memref<16x2048xf32, #tpu.memory_space<vmem>>, vector<16x2048xf32>
    %c0_1 = arith.constant 0 : index
    %c0_2 = arith.constant 0 : index
    %1 = vector.load %arg2[%c0_1, %c0_2] : memref<16x2048xf32, #tpu.memory_space<vmem>>, vector<16x2048xf32>
    %2 = arith.subf %1, %0 : vector<16x2048xf32>
    %cst = arith.constant 1.33333337 : f32
    %3 = vector.broadcast %cst : f32 to vector<16x2048xf32>
    %4 = arith.mulf %3, %2 : vector<16x2048xf32>
    %5 = arith.addf %0, %4 : vector<16x2048xf32>
    %c0_3 = arith.constant 0 : index
    %c0_4 = arith.constant 0 : index
    %6 = vector.load %arg3[%c0_3, %c0_4] : memref<16x2048xf32, #tpu.memory_space<vmem>>, vector<16x2048xf32>
    tpu.vector_store %arg3[%c0_3, %c0_4], %5 {strides = array<i32>} : memref<16x2048xf32, #tpu.memory_space<vmem>>, vector<16x2048xf32>,
    return
  }
  func.func @transform_0(%arg0: i32) -> (i32, i32) {
    %c0_i32 = arith.constant 0 : i32
    %c0_i32_0 = arith.constant 0 : i32
    return %arg0, %c0_i32 : i32, i32
  }
  func.func @transform_1(%arg0: i32) -> (i32, i32) {
    %c0_i32 = arith.constant 0 : i32
    %c0_i32_0 = arith.constant 0 : i32
    return %arg0, %c0_i32 : i32, i32
  }
  func.func @transform_2(%arg0: i32) -> (i32, i32) {
    %c0_i32 = arith.constant 0 : i32
    %c0_i32_0 = arith.constant 0 : i32
    return %arg0, %c0_i32 : i32, i32
  }
}

</mosaic_0001>

<bundles_post_ra>
// kernel: tpu_custom_call.1
= control target key start
LH: loop header
LB: loop body
LE: loop exit
PB: predicated region body
PF: predicated region fallthrough
CT: control target
= control target key end

     0   :  { %7 = vsyncpa [#allocation3], 0  ;;  %s392_s0 = inlined_call_operand.hbm [shape: f32[1,2048], index: 0, kind: input, shape index: {}]   ;;  %s393_s1 = inlined_call_operand.hbm [shape: f32[1,2048], index: 1, kind: input, shape index: {}]   ;;  %s394_s2 = inlined_call_operand.hbm [shape: f32[1,2048], index: 2, kind: output, shape index: {}]  }
   0x1   :  { %8 = vsyncpa [#allocation6], 0 }
   0x2   :  { %9 = vsyncpa [#allocation4], 0 }
   0x3   :  { %14 = vsyncadd [#allocation3], 3840  ;;  %s327_s9 = smov [#allocation2]   ;;  %s255_s13 = scalar_lea.hbm %s392_s0, 256 }
   0x4   :  { %s15_s10 = sshll.u32 %s327_s9, 4  ;;  %p256_p0 = scmp.ne.s32.totalorder %s392_s0, %s255_s13  ;;  %s16_s10 = int_to_ptr.vmem [resolvable:$true] %s15_s10 }
   0x5   :  { %p259_p1 = scmp.lt.u32.totalorder %s255_s13, %s392_s0 }
   0x7   :  { %p261_p2 = pnand %p259_p1, %p256_p0 }
   0x9   :  { %264 = shalt.err (!%p261_p2)
}
   0xa   :  { %s265_s18 = scalar_lea.vmem %s16_s10, 256  ;;  %s269_s19 = scalar_lea.vmem %s16_s10, 4096 }
   0xb   :  { %p266_p3 = scmp.ne.s32.totalorder %s16_s10, %s265_s18  ;;  %p270_p4 = scmp.lt.s32.totalorder %s16_s10, %s16_s10 }
   0xc   :  { %p271_p5 = scmp.lt.s32.totalorder %s269_s19, %s265_s18 }
   0xe   :  { %p272_p6 = por %p271_p5, %p270_p4 }
  0x10   :  { %p273_p7 = pnand %p272_p6, %p266_p3 }
  0x12   :  { %276 = shalt.err (!%p273_p7)
}
  0x13   :  { %s328_s20 = smov 256   ;;  %s329_s21 = smov 16  }
  0x14   :  { %21 = dma.hbm_to_vmem [thread:$0]  %s392_s0, 256, %s16_s10, [#allocation3], %s328_s20, %s328_s20, %s329_s21  }
  0x15   :  { %26 = vsyncadd [#allocation6], 3840  ;;  %s330_s24 = smov [#allocation5]   ;;  %s277_s28 = scalar_lea.hbm %s393_s1, 256 }
  0x16   :  { %s27_s25 = sshll.u32 %s330_s24, 4  ;;  %p278_p8 = scmp.ne.s32.totalorder %s393_s1, %s277_s28  ;;  %s28_s25 = int_to_ptr.vmem [resolvable:$true] %s27_s25 }
  0x17   :  { %p281_p9 = scmp.lt.u32.totalorder %s277_s28, %s393_s1 }
  0x19   :  { %p283_p10 = pnand %p281_p9, %p278_p8 }
  0x1b   :  { %286 = shalt.err (!%p283_p10)
}
  0x1c   :  { %s287_s5 = scalar_lea.vmem %s28_s25, 256  ;;  %s291_s0 = scalar_lea.vmem %s28_s25, 4096 }
  0x1d   :  { %p288_p11 = scmp.ne.s32.totalorder %s28_s25, %s287_s5  ;;  %p292_p12 = scmp.lt.s32.totalorder %s28_s25, %s28_s25 }
  0x1e   :  { %p293_p13 = scmp.lt.s32.totalorder %s291_s0, %s287_s5 }
  0x20   :  { %p294_p0 = por %p293_p13, %p292_p12 }
  0x22   :  { %p295_p1 = pnand %p294_p0, %p288_p11 }
  0x24   :  { %298 = shalt.err (!%p295_p1)
}
  0x25   :  { %33 = dma.hbm_to_vmem [thread:$0]  %s393_s1, 256, %s28_s25, [#allocation6], %s328_s20, %s328_s20, %s329_s21  }
  0x26   :  { %321 = dma.done.wait [#allocation3], 4096  }
  0x27   :  { %322 = vsyncadd [#allocation3], 4294963200 }
  0x28   :  { %323 = dma.done.wait [#allocation6], 4096  }
  0x29   :  { %324 = vsyncadd [#allocation6], 4294963200  ;;  %v40_v0 = vld [vmem:[#allocation2] sm:$0xff]  ;;  %v41_v2 = vld [vmem:[#allocation2 + $0x8] sm:$0xff] }
  0x2a   :  { %v72_v1 = vld [vmem:[#allocation5] sm:$0xff]  ;;  %v73_v4 = vld [vmem:[#allocation5 + $0x8] sm:$0xff]  ;;  %v42_v5 = vld [vmem:[#allocation2 + $0x10] sm:$0xff] }
  0x2b   :  { %v104_v3 = vsub.f32 %v72_v1, %v40_v0  ;;  %v74_v6 = vld [vmem:[#allocation5 + $0x10] sm:$0xff]  ;;  %v105_v7 = vsub.f32 %v73_v4, %v41_v2  ;;  %v43_v9 = vld [vmem:[#allocation2 + $0x18] sm:$0xff]  ;;  %v44_v11 = vld [vmem:[#allocation2 + $0x20] sm:$0xff] }
  0x2c   :  { %v106_v8 = vsub.f32 %v74_v6, %v42_v5  ;;  %v75_v10 = vld [vmem:[#allocation5 + $0x18] sm:$0xff]  ;;  %v76_v14 = vld [vmem:[#allocation5 + $0x20] sm:$0xff]  ;;  %v45_v15 = vld [vmem:[#allocation2 + $0x28] sm:$0xff] }
  0x2d   :  { %v136_v12 = vmul.f32 1.3333334, %v104_v3  ;;  %v107_v13 = vsub.f32 %v75_v10, %v43_v9  ;;  %v77_v16 = vld [vmem:[#allocation5 + $0x28] sm:$0xff]  ;;  %v137_v17 = vmul.f32 1.3333334, %v105_v7  ;;  %v108_v19 = vsub.f32 %v76_v14, %v44_v11  ;;  %v46_v21 = vld [vmem:[#allocation2 + $0x30] sm:$0xff] }
  0x2e   :  { %v138_v18 = vmul.f32 1.3333334, %v106_v8  ;;  %v109_v20 = vsub.f32 %v77_v16, %v45_v15  ;;  %v78_v22 = vld [vmem:[#allocation5 + $0x30] sm:$0xff]  ;;  %v47_v26 = vld [vmem:[#allocation2 + $0x38] sm:$0xff]  ;;  %v48_v28 = vld [vmem:[#allocation2 + $0x40] sm:$0xff] }
  0x2f   :  { %v168_v23 = vadd.f32 %v136_v12, %v40_v0  ;;  %v139_v24 = vmul.f32 1.3333334, %v107_v13  ;;  %v110_v25 = vsub.f32 %v78_v22, %v46_v21  ;;  %v79_v27 = vld [vmem:[#allocation5 + $0x38] sm:$0xff]  ;;  %v169_v29 = vadd.f32 %v137_v17, %v41_v2  ;;  %v80_v33 = vld [vmem:[#allocation5 + $0x40] sm:$0xff]  ;;  %v49_v34 = vld [vmem:[#allocation2 + $0x48] sm:$0xff] }
  0x30   :  { %v170_v30 = vadd.f32 %v138_v18, %v42_v5  ;;  %v140_v31 = vmul.f32 1.3333334, %v108_v19  ;;  %v141_v32 = vmul.f32 1.3333334, %v109_v20  ;;  %v111_v37 = vsub.f32 %v79_v27, %v47_v26  ;;  %v81_v39 = vld [vmem:[#allocation5 + $0x48] sm:$0xff]  ;;  %v50_v40 = vld [vmem:[#allocation2 + $0x50] sm:$0xff] }
  0x31   :  { %200 = vst [vmem:[#allocation7] sm:$0xff] %v168_v23  ;;  %v171_v35 = vadd.f32 %v139_v24, %v43_v9  ;;  %v142_v36 = vmul.f32 1.3333334, %v110_v25  ;;  %v112_v38 = vsub.f32 %v80_v33, %v48_v28  ;;  %v82_v41 = vld [vmem:[#allocation5 + $0x50] sm:$0xff]  ;;  %201 = vst [vmem:[#allocation7 + $0x8] sm:$0xff] %v169_v29  ;;  %v113_v44 = vsub.f32 %v81_v39, %v49_v34  ;;  %v51_v46 = vld [vmem:[#allocation2 + $0x58] sm:$0xff] }
  0x32   :  { %202 = vst [vmem:[#allocation7 + $0x10] sm:$0xff] %v170_v30  ;;  %v172_v42 = vadd.f32 %v140_v31, %v44_v11  ;;  %v173_v43 = vadd.f32 %v141_v32, %v45_v15  ;;  %v114_v45 = vsub.f32 %v82_v41, %v50_v40  ;;  %v83_v47 = vld [vmem:[#allocation5 + $0x58] sm:$0xff]  ;;  %v52_v48 = vld [vmem:[#allocation2 + $0x60] sm:$0xff]  ;;  %v143_v50 = vmul.f32 1.3333334, %v111_v37  ;;  %v53_v54 = vld [vmem:[#allocation2 + $0x68] sm:$0xff] }
  0x33   :  { %203 = vst [vmem:[#allocation7 + $0x18] sm:$0xff] %v171_v35  ;;  %v174_v49 = vadd.f32 %v142_v36, %v46_v21  ;;  %v144_v51 = vmul.f32 1.3333334, %v112_v38  ;;  %v115_v52 = vsub.f32 %v83_v47, %v51_v46  ;;  %v84_v53 = vld [vmem:[#allocation5 + $0x60] sm:$0xff]  ;;  %v145_v55 = vmul.f32 1.3333334, %v113_v44 }
  0x34   :  { %204 = vst [vmem:[#allocation7 + $0x20] sm:$0xff] %v172_v42  ;;  %205 = vst [vmem:[#allocation7 + $0x28] sm:$0xff] %v173_v43  ;;  %v146_v56 = vmul.f32 1.3333334, %v114_v45  ;;  %v116_v57 = vsub.f32 %v84_v53, %v52_v48  ;;  %v85_v58 = vld [vmem:[#allocation5 + $0x68] sm:$0xff]  ;;  %v54_v59 = vld [vmem:[#allocation2 + $0x70] sm:$0xff]  ;;  %v175_v60 = vadd.f32 %v143_v50, %v47_v26 }
  0x35   :  { %206 = vst [vmem:[#allocation7 + $0x30] sm:$0xff] %v174_v49  ;;  %v176_v61 = vadd.f32 %v144_v51, %v48_v28  ;;  %v147_v62 = vmul.f32 1.3333334, %v115_v52  ;;  %v117_v63 = vsub.f32 %v85_v58, %v53_v54  ;;  %v86_v0 = vld [vmem:[#allocation5 + $0x70] sm:$0xff]  ;;  %v55_v1 = vld [vmem:[#allocation2 + $0x78] sm:$0xff]  ;;  %v177_v3 = vadd.f32 %v145_v55, %v49_v34  ;;  %v56_v7 = vld [vmem:[#allocation2 + $0x80] sm:$0xff] }
  0x36   :  { %v87_v2 = vld [vmem:[#allocation5 + $0x78] sm:$0xff]  ;;  %v178_v4 = vadd.f32 %v146_v56, %v50_v40  ;;  %v148_v5 = vmul.f32 1.3333334, %v116_v57  ;;  %v118_v6 = vsub.f32 %v86_v0, %v54_v59  ;;  %v88_v8 = vld [vmem:[#allocation5 + $0x80] sm:$0xff]  ;;  %v57_v9 = vld [vmem:[#allocation2 + $0x88] sm:$0xff]  ;;  %207 = vst [vmem:[#allocation7 + $0x38] sm:$0xff] %v175_v60 }
  0x37   :  { %208 = vst [vmem:[#allocation7 + $0x40] sm:$0xff] %v176_v61  ;;  %v179_v10 = vadd.f32 %v147_v62, %v51_v46  ;;  %v149_v11 = vmul.f32 1.3333334, %v117_v63  ;;  %v119_v12 = vsub.f32 %v87_v2, %v55_v1  ;;  %v120_v13 = vsub.f32 %v88_v8, %v56_v7  ;;  %v89_v14 = vld [vmem:[#allocation5 + $0x88] sm:$0xff]  ;;  %v58_v15 = vld [vmem:[#allocation2 + $0x90] sm:$0xff]  ;;  %209 = vst [vmem:[#allocation7 + $0x48] sm:$0xff] %v177_v3 }
  0x38   :  { %v90_v16 = vld [vmem:[#allocation5 + $0x90] sm:$0xff]  ;;  %210 = vst [vmem:[#allocation7 + $0x50] sm:$0xff] %v178_v4  ;;  %v180_v17 = vadd.f32 %v148_v5, %v52_v48  ;;  %v150_v18 = vmul.f32 1.3333334, %v118_v6  ;;  %v121_v19 = vsub.f32 %v89_v14, %v57_v9  ;;  %v59_v21 = vld [vmem:[#allocation2 + $0x98] sm:$0xff]  ;;  %v60_v23 = vld [vmem:[#allocation2 + $0xa0] sm:$0xff] }
  0x39   :  { %v122_v20 = vsub.f32 %v90_v16, %v58_v15  ;;  %v91_v22 = vld [vmem:[#allocation5 + $0x98] sm:$0xff]  ;;  %211 = vst [vmem:[#allocation7 + $0x58] sm:$0xff] %v179_v10  ;;  %v181_v24 = vadd.f32 %v149_v11, %v53_v54  ;;  %v151_v25 = vmul.f32 1.3333334, %v119_v12  ;;  %v152_v26 = vmul.f32 1.3333334, %v120_v13 }
  0x3a   :  { %v123_v27 = vsub.f32 %v91_v22, %v59_v21  ;;  %v92_v28 = vld [vmem:[#allocation5 + $0xa0] sm:$0xff]  ;;  %v61_v29 = vld [vmem:[#allocation2 + $0xa8] sm:$0xff]  ;;  %212 = vst [vmem:[#allocation7 + $0x60] sm:$0xff] %v180_v17  ;;  %v182_v30 = vadd.f32 %v150_v18, %v54_v59  ;;  %v153_v31 = vmul.f32 1.3333334, %v121_v19  ;;  %v62_v35 = vld [vmem:[#allocation2 + $0xb0] sm:$0xff] }
  0x3b   :  { %v154_v32 = vmul.f32 1.3333334, %v122_v20  ;;  %v124_v33 = vsub.f32 %v92_v28, %v60_v23  ;;  %v93_v34 = vld [vmem:[#allocation5 + $0xa8] sm:$0xff]  ;;  %213 = vst [vmem:[#allocation7 + $0x68] sm:$0xff] %v181_v24  ;;  %v183_v36 = vadd.f32 %v151_v25, %v55_v1  ;;  %v184_v37 = vadd.f32 %v152_v26, %v56_v7  ;;  %v94_v40 = vld [vmem:[#allocation5 + $0xb0] sm:$0xff]  ;;  %v63_v41 = vld [vmem:[#allocation2 + $0xb8] sm:$0xff] }
  0x3c   :  { %v155_v38 = vmul.f32 1.3333334, %v123_v27  ;;  %v125_v39 = vsub.f32 %v93_v34, %v61_v29  ;;  %v95_v42 = vld [vmem:[#allocation5 + $0xb8] sm:$0xff]  ;;  %214 = vst [vmem:[#allocation7 + $0x70] sm:$0xff] %v182_v30  ;;  %v185_v43 = vadd.f32 %v153_v31, %v57_v9  ;;  %v126_v46 = vsub.f32 %v94_v40, %v62_v35  ;;  %v64_v47 = vld [vmem:[#allocation2 + $0xc0] sm:$0xff]  ;;  %v65_v49 = vld [vmem:[#allocation2 + $0xc8] sm:$0xff] }
  0x3d   :  { %v186_v44 = vadd.f32 %v154_v32, %v58_v15  ;;  %v156_v45 = vmul.f32 1.3333334, %v124_v33  ;;  %v96_v48 = vld [vmem:[#allocation5 + $0xc0] sm:$0xff]  ;;  %215 = vst [vmem:[#allocation7 + $0x78] sm:$0xff] %v183_v36  ;;  %216 = vst [vmem:[#allocation7 + $0x80] sm:$0xff] %v184_v37  ;;  %v127_v52 = vsub.f32 %v95_v42, %v63_v41  ;;  %v97_v54 = vld [vmem:[#allocation5 + $0xc8] sm:$0xff] }
  0x3e   :  { %v187_v50 = vadd.f32 %v155_v38, %v59_v21  ;;  %v157_v51 = vmul.f32 1.3333334, %v125_v39  ;;  %v128_v53 = vsub.f32 %v96_v48, %v64_v47  ;;  %v66_v55 = vld [vmem:[#allocation2 + $0xd0] sm:$0xff]  ;;  %217 = vst [vmem:[#allocation7 + $0x88] sm:$0xff] %v185_v43  ;;  %v158_v58 = vmul.f32 1.3333334, %v126_v46 }
  0x3f   :  { %v98_v56 = vld [vmem:[#allocation5 + $0xd0] sm:$0xff]  ;;  %218 = vst [vmem:[#allocation7 + $0x90] sm:$0xff] %v186_v44  ;;  %v188_v57 = vadd.f32 %v156_v45, %v60_v23  ;;  %v129_v59 = vsub.f32 %v97_v54, %v65_v49  ;;  %v67_v61 = vld [vmem:[#allocation2 + $0xd8] sm:$0xff]  ;;  %v68_v63 = vld [vmem:[#allocation2 + $0xe0] sm:$0xff]  ;;  %v159_v1 = vmul.f32 1.3333334, %v127_v52 }
  0x40   :  { %v130_v60 = vsub.f32 %v98_v56, %v66_v55  ;;  %v99_v62 = vld [vmem:[#allocation5 + $0xd8] sm:$0xff]  ;;  %219 = vst [vmem:[#allocation7 + $0x98] sm:$0xff] %v187_v50  ;;  %v189_v0 = vadd.f32 %v157_v51, %v61_v29  ;;  %v160_v2 = vmul.f32 1.3333334, %v128_v53  ;;  %v100_v4 = vld [vmem:[#allocation5 + $0xe0] sm:$0xff]  ;;  %v69_v5 = vld [vmem:[#allocation2 + $0xe8] sm:$0xff]  ;;  %v190_v6 = vadd.f32 %v158_v58, %v62_v35 }
  0x41   :  { %v131_v3 = vsub.f32 %v99_v62, %v67_v61  ;;  %220 = vst [vmem:[#allocation7 + $0xa0] sm:$0xff] %v188_v57  ;;  %v161_v7 = vmul.f32 1.3333334, %v129_v59  ;;  %v132_v9 = vsub.f32 %v100_v4, %v68_v63  ;;  %v101_v10 = vld [vmem:[#allocation5 + $0xe8] sm:$0xff]  ;;  %v70_v11 = vld [vmem:[#allocation2 + $0xf0] sm:$0xff]  ;;  %v191_v12 = vadd.f32 %v159_v1, %v63_v41  ;;  %v71_v17 = vld [vmem:[#allocation2 + $0xf8] sm:$0xff] }
  0x42   :  { %v162_v8 = vmul.f32 1.3333334, %v130_v60  ;;  %221 = vst [vmem:[#allocation7 + $0xa8] sm:$0xff] %v189_v0  ;;  %v192_v13 = vadd.f32 %v160_v2, %v64_v47  ;;  %v133_v15 = vsub.f32 %v101_v10, %v69_v5  ;;  %v102_v16 = vld [vmem:[#allocation5 + $0xf0] sm:$0xff]  ;;  %v103_v18 = vld [vmem:[#allocation5 + $0xf8] sm:$0xff]  ;;  %222 = vst [vmem:[#allocation7 + $0xb0] sm:$0xff] %v190_v6 }
  0x43   :  { %v163_v14 = vmul.f32 1.3333334, %v131_v3  ;;  %v193_v19 = vadd.f32 %v161_v7, %v65_v49  ;;  %v164_v21 = vmul.f32 1.3333334, %v132_v9  ;;  %v134_v22 = vsub.f32 %v102_v16, %v70_v11  ;;  %223 = vst [vmem:[#allocation7 + $0xb8] sm:$0xff] %v191_v12 }
  0x44   :  { %v194_v20 = vadd.f32 %v162_v8, %v66_v55  ;;  %224 = vst [vmem:[#allocation7 + $0xc0] sm:$0xff] %v192_v13  ;;  %v165_v24 = vmul.f32 1.3333334, %v133_v15  ;;  %v135_v25 = vsub.f32 %v103_v18, %v71_v17 }
  0x45   :  { %v195_v23 = vadd.f32 %v163_v14, %v67_v61  ;;  %225 = vst [vmem:[#allocation7 + $0xc8] sm:$0xff] %v193_v19  ;;  %v196_v26 = vadd.f32 %v164_v21, %v68_v63  ;;  %v166_v27 = vmul.f32 1.3333334, %v134_v22 }
  0x46   :  { %226 = vst [vmem:[#allocation7 + $0xd0] sm:$0xff] %v194_v20  ;;  %v197_v28 = vadd.f32 %v165_v24, %v69_v5  ;;  %v167_v29 = vmul.f32 1.3333334, %v135_v25 }
  0x47   :  { %227 = vst [vmem:[#allocation7 + $0xd8] sm:$0xff] %v195_v23  ;;  %228 = vst [vmem:[#allocation7 + $0xe0] sm:$0xff] %v196_v26  ;;  %v198_v30 = vadd.f32 %v166_v27, %v70_v11 }
  0x48   :  { %229 = vst [vmem:[#allocation7 + $0xe8] sm:$0xff] %v197_v28  ;;  %v199_v31 = vadd.f32 %v167_v29, %v71_v17 }
  0x49   :  { %230 = vst [vmem:[#allocation7 + $0xf0] sm:$0xff] %v198_v30 }
  0x4a   :  { %231 = vst [vmem:[#allocation7 + $0xf8] sm:$0xff] %v199_v31 }
  0x4b   :  { %236 = vsyncadd [#allocation4], 3840  ;;  %s331_s1 = smov [#allocation7]  }
  0x4c   :  { %s237_s8 = sshll.u32 %s331_s1, 4  ;;  %s238_s8 = int_to_ptr.vmem [resolvable:$true] %s237_s8 }
  0x4d   :  { %s299_s9 = scalar_lea.vmem %s238_s8, 256  ;;  %s303_s10 = scalar_lea.vmem %s238_s8, 4096 }
  0x4e   :  { %p300_p2 = scmp.ne.s32.totalorder %s238_s8, %s299_s9  ;;  %p304_p3 = scmp.lt.s32.totalorder %s238_s8, %s238_s8 }
  0x4f   :  { %p305_p4 = scmp.lt.s32.totalorder %s303_s10, %s299_s9 }
  0x51   :  { %p306_p5 = por %p305_p4, %p304_p3 }
  0x53   :  { %p307_p6 = pnand %p306_p5, %p300_p2 }
  0x55   :  { %310 = shalt.err (!%p307_p6)
}
  0x56   :  { %s311_s13 = scalar_lea.hbm %s394_s2, 256 }
  0x57   :  { %p312_p7 = scmp.ne.s32.totalorder %s394_s2, %s311_s13  ;;  %p315_p8 = scmp.lt.u32.totalorder %s311_s13, %s394_s2 }
  0x59   :  { %p317_p9 = pnand %p315_p8, %p312_p7 }
  0x5b   :  { %320 = shalt.err (!%p317_p9)
}
  0x5c   :  { %243 = dma.vmem_to_hbm [thread:$0]  %s238_s8, 256, %s394_s2, [#allocation4], %s328_s20, %s328_s20, %s329_s21  }
  0x5d   :  { %325 = dma.done.wait [#allocation4], 4096  }
  0x5e   :  { %326 = vsyncadd [#allocation4], 4294963200 }
  0x5f   :  { %247 = vsyncpa [#allocation3], 1 }
  0x60   :  { %248 = vsyncpa [#allocation6], 1 }
  0x61   :  { %249 = vsyncpa [#allocation4], 1 }

</bundles_post_ra>
